<compile_context>
chip_gen: v7x
topology: tpu7x:2x2x1
jax: 0.10.0
libtpu: 0.0.40
codegen_flags: <defaults>
</compile_context>

<pallas_src>
import functools

import jax
import jax.numpy as jnp
from jax.experimental import pallas as pl
from jax.experimental.pallas import tpu as pltpu


def _round_up(n, m):
    return ((n + m - 1) // m) * m


def _critic_kernel(n_hidden, *refs):
    """refs = (x, w0, b0, ..., w_{h-1}, b_{h-1}, w_last_mat, b_last_row, out)."""
    x_ref = refs[0]
    out_ref = refs[-1]
    b_last_ref = refs[-2]          # (1, 128) f32, bias replicated across lanes
    w_last_ref = refs[-3]          # (K_pad, 128), real weights in column 0
    hidden_refs = refs[1:-3]

    h = x_ref[...]                 # (tile_b, d_in) — unpadded input block
    for i in range(n_hidden):
        w = hidden_refs[2 * i][...]          # (K, N_pad)
        b = hidden_refs[2 * i + 1][...]      # (1, N_pad) f32
        # MXU matmul with f32 accumulation; activations cast to weight dtype
        # (no-op for f32, bf16 for the bf16 MXU path).
        h = jnp.dot(h.astype(w.dtype), w, preferred_element_type=jnp.float32)
        h = jnp.maximum(h + b, 0.0)          # bias + ReLU in f32 on the VPU

    # Final out_dim=1 layer as a lane-dense MXU matmul: (tile_b, K_pad) @
    # (K_pad, 128) with w_last in column 0.  Full (tile_b, 128) store is
    # unmasked; column 0 is the real output, the rest is discarded upstream.
    w_last = w_last_ref[...]
    out = jnp.dot(h.astype(w_last.dtype), w_last,
                  preferred_element_type=jnp.float32)
    out_ref[...] = (out + b_last_ref[...]).astype(out_ref.dtype)


def prepare_critic_params(weights, biases, compute_dtype=jnp.float32):
    """One-time padding/cast of parameters (hoisted out of the forward path).

    weights: list of (in_i, out_i) arrays (transposed from PyTorch (out, in));
             last layer has out = 1.
    biases:  list of (1, out_i) arrays.
    compute_dtype: dtype fed to the MXU (jnp.bfloat16 recommended on
             v5e/v6e/v7x; accumulation stays f32 either way).
    """
    n_layers = len(weights)
    n_hidden = n_layers - 1
    d_in = int(weights[0].shape[0])

    # Hidden dims padded to the 128 lane width; the first matmul keeps
    # K = d_in (x is streamed unpadded).
    pdims = [_round_up(int(w.shape[1]), 128) for w in weights[:n_hidden]]
    k_dims = [d_in] + pdims

    operands = []
    for i in range(n_hidden):
        w, b = weights[i], biases[i]
        wp = jnp.zeros((k_dims[i], pdims[i]), compute_dtype)
        wp = wp.at[: w.shape[0], : w.shape[1]].set(w.astype(compute_dtype))
        bp = jnp.zeros((1, pdims[i]), jnp.float32)
        bp = bp.at[:, : b.shape[1]].set(b.astype(jnp.float32))
        operands += [wp, bp]

    w_last, b_last = weights[-1], biases[-1]          # (K, 1), (1, 1)
    wl = jnp.zeros((k_dims[-1], 128), compute_dtype)
    wl = wl.at[: w_last.shape[0], :1].set(w_last.astype(compute_dtype))
    bl = (jnp.zeros((1, 128), jnp.float32)
          + jnp.asarray(b_last, jnp.float32).reshape(1, 1))
    operands += [wl, bl]

    return {
        "operands": tuple(jax.device_put(o) for o in operands),
        "n_hidden": n_hidden,
        "d_in": d_in,
        "pdims": tuple(pdims),
    }


def critic_forward(x, params, *, tile_b_max=1024, split_threshold=512):
    """Fused Critic MLP forward.

    x:      (B, full_state_action_dims); f32 (or bf16 if the producer emits it)
    params: output of prepare_critic_params()
    returns: (B, 1) float32
    """
    operands = params["operands"]
    n_hidden = params["n_hidden"]
    d_in = params["d_in"]
    pdims = params["pdims"]

    B = int(x.shape[0])
    assert int(x.shape[1]) == d_in, (x.shape, d_in)

    # Batch tiling: large tiles amortize per-step overhead; for medium/large
    # batches cap the tile near B/2 so grid >= 2 blocks (both v7x cores busy).
    tb_full = _round_up(B, 8)
    if tb_full <= tile_b_max:
        tile_b = _round_up(pl.cdiv(B, 2), 8) if B >= split_threshold else tb_full
    else:
        tile_b = tile_b_max
    grid_b = pl.cdiv(B, tile_b)

    in_specs = [pl.BlockSpec((tile_b, d_in), lambda g: (g, 0))]
    for op in operands:
        # Constant index_map: weights/biases DMA'd once, resident in VMEM.
        in_specs.append(pl.BlockSpec(op.shape, lambda g: (0, 0)))
    out_spec = pl.BlockSpec((tile_b, 128), lambda g: (g, 0))

    # Advisory cost estimate so XLA can overlap this latency-class call.
    k_dims = [d_in] + list(pdims)
    flops = 2 * B * (sum(k_dims[i] * pdims[i] for i in range(n_hidden))
                     + k_dims[-1] * 128)
    bytes_accessed = (int(x.size) * x.dtype.itemsize
                      + sum(int(o.size) * o.dtype.itemsize for o in operands)
                      + B * 128 * 4)
    cost = pl.CostEstimate(flops=int(flops), transcendentals=0,
                           bytes_accessed=int(bytes_accessed))

    kernel = functools.partial(_critic_kernel, n_hidden)

    out = pl.pallas_call(
        kernel,
        out_shape=jax.ShapeDtypeStruct((B, 128), jnp.float32),
        grid=(grid_b,),
        in_specs=in_specs,
        out_specs=out_spec,
        compiler_params=pltpu.CompilerParams(
            dimension_semantics=("parallel",)),
        cost_estimate=cost,
    )(x, *operands)

    return out[:, :1]


def init_critic_params(key, full_state_action_dims, net_arch):
    """Deterministic init matching the PyTorch module's layer shapes.

    Layer dims: [full_state_action_dims] + net_arch + [1].
    Returns weights as (in, out) and biases as (1, out).
    """
    dims = [full_state_action_dims] + list(net_arch) + [1]
    weights, biases = [], []
    for i in range(len(dims) - 1):
        fan_in, fan_out = dims[i], dims[i + 1]
        key, wk, bk = jax.random.split(key, 3)
        bound = 1.0 / jnp.sqrt(jnp.float32(fan_in))
        w = jax.random.uniform(
            wk, (fan_in, fan_out), jnp.float32, minval=-bound, maxval=bound)
        b = jax.random.uniform(
            bk, (1, fan_out), jnp.float32, minval=-bound, maxval=bound)
        weights.append(w)
        biases.append(b)
    return weights, biases


def critic_reference(x, weights, biases):
    """Pure-JAX reference for correctness checking."""
    h = x
    n = len(weights)
    for i, (w, b) in enumerate(zip(weights, biases)):
        h = h @ w + b
        if i < n - 1:
            h = jnp.maximum(h, 0.0)
    return h


if __name__ == "__main__":
    # Tennis env style: 2 agents x (24 obs + 2 action) = 52 input dims.
    batch = 8
    full_state_action_dims = 52
    net_arch = [64, 32]

    key = jax.random.PRNGKey(0)
    key, xk = jax.random.split(key)
    x = jax.random.normal(xk, (batch, full_state_action_dims), jnp.float32)

    weights, biases = init_critic_params(key, full_state_action_dims, net_arch)

    # One-time parameter padding/cast (hoisted out of the forward path).
    params_f32 = prepare_critic_params(weights, biases)

    # Small batch, f32: exact-semantics check (single grid block).
    out = jax.block_until_ready(critic_forward(x, params_f32))
    ref = critic_reference(x, weights, biases)
    assert out.shape == (batch, 1), out.shape
    assert jnp.allclose(out, ref, atol=1e-4, rtol=1e-4), (out, ref)

    # Larger, non-multiple-of-tile batch: exercises grid_b == 2 (two blocks
    # for v7x megacore) and the masked partial last block.
    key, xk2 = jax.random.split(key)
    xb = jax.random.normal(xk2, (1000, full_state_action_dims), jnp.float32)
    outb = jax.block_until_ready(critic_forward(xb, params_f32))
    refb = critic_reference(xb, weights, biases)
    assert outb.shape == (1000, 1), outb.shape
    assert jnp.allclose(outb, refb, atol=1e-4, rtol=1e-4)

    # bf16 MXU path (recommended on v5e/v6e/v7x); f32 accumulation, loose tol.
    params_bf16 = prepare_critic_params(weights, biases,
                                        compute_dtype=jnp.bfloat16)
    outbf = jax.block_until_ready(critic_forward(xb, params_bf16))
    assert outbf.shape == (1000, 1), outbf.shape
    assert jnp.allclose(outbf, refb, atol=1e-1, rtol=1e-1)

    print("KERNEL_OK")
</pallas_src>

<mosaic_0001>
module attributes {stable_mosaic.version = 11 : i64} {
  func.func @_critic_kernel(%arg0: i32, %arg1: memref<8x52xf32, #tpu.memory_space<vmem>>, %arg2: memref<52x128xf32, #tpu.memory_space<vmem>>, %arg3: memref<1x128xf32, #tpu.memory_space<vmem>>, %arg4: memref<128x128xf32, #tpu.memory_space<vmem>>, %arg5: memref<1x128xf32, #tpu.memory_space<vmem>>, %arg6: memref<128x128xf32, #tpu.memory_space<vmem>>, %arg7: memref<1x128xf32, #tpu.memory_space<vmem>>, %arg8: memref<8x128xf32, #tpu.memory_space<vmem>>) attributes {dimension_semantics = [#tpu.dimension_semantics<parallel>], iteration_bounds = array<i64: 1>, scalar_prefetch = 0 : i64, scratch_operands = 0 : i64, tpu.core_type = #tpu.core_type<tc>, window_params = [{transform_indices = @transform_0, window_bounds = array<i64: 8, 52>}, {pipeline_mode = #tpu.pipeline_mode<synchronous>, transform_indices = @transform_1, window_bounds = array<i64: 52, 128>}, {pipeline_mode = #tpu.pipeline_mode<synchronous>, transform_indices = @transform_2, window_bounds = array<i64: 1, 128>}, {pipeline_mode = #tpu.pipeline_mode<synchronous>, transform_indices = @transform_3, window_bounds = array<i64: 128, 128>}, {pipeline_mode = #tpu.pipeline_mode<synchronous>, transform_indices = @transform_4, window_bounds = array<i64: 1, 128>}, {pipeline_mode = #tpu.pipeline_mode<synchronous>, transform_indices = @transform_5, window_bounds = array<i64: 128, 128>}, {pipeline_mode = #tpu.pipeline_mode<synchronous>, transform_indices = @transform_6, window_bounds = array<i64: 1, 128>}, {transform_indices = @transform_7, window_bounds = array<i64: 8, 128>}]} {
    %c0 = arith.constant 0 : index
    %c0_0 = arith.constant 0 : index
    %0 = vector.load %arg1[%c0, %c0_0] : memref<8x52xf32, #tpu.memory_space<vmem>>, vector<8x52xf32>
    %c0_1 = arith.constant 0 : index
    %c0_2 = arith.constant 0 : index
    %1 = vector.load %arg2[%c0_1, %c0_2] : memref<52x128xf32, #tpu.memory_space<vmem>>, vector<52x128xf32>
    %c0_3 = arith.constant 0 : index
    %c0_4 = arith.constant 0 : index
    %2 = vector.load %arg3[%c0_3, %c0_4] : memref<1x128xf32, #tpu.memory_space<vmem>>, vector<1x128xf32>
    %cst = arith.constant dense<0.000000e+00> : vector<8x128xf32>
    %3 = tpu.matmul %0, %1, %cst {dimension_numbers = #tpu.dot_dimension_numbers<[1], [0], [0], [1], [0, 0, 1, 1], [], []>} : vector<8x52xf32>, vector<52x128xf32>, vector<8x128xf32> -> vector<8x128xf32>
    %4 = vector.broadcast %2 : vector<1x128xf32> to vector<8x128xf32>
    %5 = arith.addf %3, %4 : vector<8x128xf32>
    %cst_5 = arith.constant 0.000000e+00 : f32
    %6 = vector.broadcast %cst_5 : f32 to vector<8x128xf32>
    %7 = arith.maximumf %5, %6 : vector<8x128xf32>
    %c0_6 = arith.constant 0 : index
    %c0_7 = arith.constant 0 : index
    %8 = vector.load %arg4[%c0_6, %c0_7] : memref<128x128xf32, #tpu.memory_space<vmem>>, vector<128x128xf32>
    %c0_8 = arith.constant 0 : index
    %c0_9 = arith.constant 0 : index
    %9 = vector.load %arg5[%c0_8, %c0_9] : memref<1x128xf32, #tpu.memory_space<vmem>>, vector<1x128xf32>
    %cst_10 = arith.constant dense<0.000000e+00> : vector<8x128xf32>
    %10 = tpu.matmul %7, %8, %cst_10 {dimension_numbers = #tpu.dot_dimension_numbers<[1], [0], [0], [1], [0, 0, 1, 1], [], []>} : vector<8x128xf32>, vector<128x128xf32>, vector<8x128xf32> -> vector<8x128xf32>
    %11 = vector.broadcast %9 : vector<1x128xf32> to vector<8x128xf32>
    %12 = arith.addf %10, %11 : vector<8x128xf32>
    %cst_11 = arith.constant 0.000000e+00 : f32
    %13 = vector.broadcast %cst_11 : f32 to vector<8x128xf32>
    %14 = arith.maximumf %12, %13 : vector<8x128xf32>
    %c0_12 = arith.constant 0 : index
    %c0_13 = arith.constant 0 : index
    %15 = vector.load %arg6[%c0_12, %c0_13] : memref<128x128xf32, #tpu.memory_space<vmem>>, vector<128x128xf32>
    %cst_14 = arith.constant dense<0.000000e+00> : vector<8x128xf32>
    %16 = tpu.matmul %14, %15, %cst_14 {dimension_numbers = #tpu.dot_dimension_numbers<[1], [0], [0], [1], [0, 0, 1, 1], [], []>} : vector<8x128xf32>, vector<128x128xf32>, vector<8x128xf32> -> vector<8x128xf32>
    %c0_15 = arith.constant 0 : index
    %c0_16 = arith.constant 0 : index
    %17 = vector.load %arg7[%c0_15, %c0_16] : memref<1x128xf32, #tpu.memory_space<vmem>>, vector<1x128xf32>
    %18 = vector.broadcast %17 : vector<1x128xf32> to vector<8x128xf32>
    %19 = arith.addf %16, %18 : vector<8x128xf32>
    %c0_17 = arith.constant 0 : index
    %c0_18 = arith.constant 0 : index
    %20 = vector.load %arg8[%c0_17, %c0_18] : memref<8x128xf32, #tpu.memory_space<vmem>>, vector<8x128xf32>
    tpu.vector_store %arg8[%c0_17, %c0_18], %19 {strides = array<i32>} : memref<8x128xf32, #tpu.memory_space<vmem>>, vector<8x128xf32>,
    return
  }
  func.func @transform_0(%arg0: i32) -> (i32, i32) {
    %c0_i32 = arith.constant 0 : i32
    %c0_i32_0 = arith.constant 0 : i32
    return %arg0, %c0_i32 : i32, i32
  }
  func.func @transform_1(%arg0: i32) -> (i32, i32) {
    %c0_i32 = arith.constant 0 : i32
    %c0_i32_0 = arith.constant 0 : i32
    %c0_i32_1 = arith.constant 0 : i32
    return %c0_i32, %c0_i32_0 : i32, i32
  }
  func.func @transform_2(%arg0: i32) -> (i32, i32) {
    %c0_i32 = arith.constant 0 : i32
    %c0_i32_0 = arith.constant 0 : i32
    %c0_i32_1 = arith.constant 0 : i32
    return %c0_i32, %c0_i32_0 : i32, i32
  }
  func.func @transform_3(%arg0: i32) -> (i32, i32) {
    %c0_i32 = arith.constant 0 : i32
    %c0_i32_0 = arith.constant 0 : i32
    %c0_i32_1 = arith.constant 0 : i32
    return %c0_i32, %c0_i32_0 : i32, i32
  }
  func.func @transform_4(%arg0: i32) -> (i32, i32) {
    %c0_i32 = arith.constant 0 : i32
    %c0_i32_0 = arith.constant 0 : i32
    %c0_i32_1 = arith.constant 0 : i32
    return %c0_i32, %c0_i32_0 : i32, i32
  }
  func.func @transform_5(%arg0: i32) -> (i32, i32) {
    %c0_i32 = arith.constant 0 : i32
    %c0_i32_0 = arith.constant 0 : i32
    %c0_i32_1 = arith.constant 0 : i32
    return %c0_i32, %c0_i32_0 : i32, i32
  }
  func.func @transform_6(%arg0: i32) -> (i32, i32) {
    %c0_i32 = arith.constant 0 : i32
    %c0_i32_0 = arith.constant 0 : i32
    %c0_i32_1 = arith.constant 0 : i32
    return %c0_i32, %c0_i32_0 : i32, i32
  }
  func.func @transform_7(%arg0: i32) -> (i32, i32) {
    %c0_i32 = arith.constant 0 : i32
    %c0_i32_0 = arith.constant 0 : i32
    return %arg0, %c0_i32 : i32, i32
  }
}

</mosaic_0001>

<bundles_post_ra>
// kernel: tpu_custom_call.1
= control target key start
LH: loop header
LB: loop body
LE: loop exit
PB: predicated region body
PF: predicated region fallthrough
CT: control target
= control target key end

     0   :  { %12 = vsyncpa [#allocation3], 0  ;;  %s848_s0 = inlined_call_operand.hbm [shape: f32[8,52], index: 0, kind: input, shape index: {}]   ;;  %s849_s1 = inlined_call_operand.hbm [shape: f32[52,128], index: 1, kind: input, shape index: {}]   ;;  %s850_s2 = inlined_call_operand.vmem [shape: f32[1,128], index: 2, kind: input, shape index: {}]   ;;  %s851_s3 = inlined_call_operand.hbm [shape: f32[128,128], index: 3, kind: input, shape index: {}]   ;;  %s852_s4 = inlined_call_operand.vmem [shape: f32[1,128], index: 4, kind: input, shape index: {}]   ;;  %s853_s5 = inlined_call_operand.hbm [shape: f32[128,128], index: 5, kind: input, shape index: {}]   ;;  %s854_s6 = inlined_call_operand.vmem [shape: f32[1,128], index: 6, kind: input, shape index: {}]   ;;  %s855_s7 = inlined_call_operand.hbm [shape: f32[8,128], index: 7, kind: output, shape index: {}]  }
   0x1   :  { %13 = vsyncpa [#allocation6], 0 }
   0x2   :  { %14 = vsyncpa [#allocation9], 0 }
   0x3   :  { %15 = vsyncpa [#allocation4], 0  ;;  %s698_s24 = smov [#allocation5]   ;;  %s580_s28 = scalar_lea.hbm %s849_s1, 896 }
   0x4   :  { %s31_s25 = sshll.u32 %s698_s24, 4  ;;  %p581_p0 = scmp.ne.s32.totalorder %s849_s1, %s580_s28  ;;  %s32_s25 = int_to_ptr.vmem [resolvable:$true] %s31_s25 }
   0x5   :  { %p584_p1 = scmp.lt.u32.totalorder %s580_s28, %s849_s1 }
   0x7   :  { %p586_p2 = pnand %p584_p1, %p581_p0 }
   0x9   :  { %589 = shalt.err (!%p586_p2)
}
   0xa   :  { %s590_s10 = scalar_lea.vmem %s32_s25, 896  ;;  %p595_p4 = scmp.lt.s32.totalorder %s32_s25, %s32_s25 }
   0xb   :  { %p591_p3 = scmp.ne.s32.totalorder %s32_s25, %s590_s10  ;;  %p596_p5 = scmp.lt.s32.totalorder %s590_s10, %s590_s10 }
   0xd   :  { %p597_p6 = por %p596_p5, %p595_p4 }
   0xf   :  { %p598_p7 = pnand %p597_p6, %p591_p3 }
  0x11   :  { %601 = shalt.err (!%p598_p7)
}
  0x12   :  { %s699_s11 = smov 128   ;;  %s700_s12 = smov 8  }
  0x13   :  { %37 = dma.hbm_to_vmem [thread:$0]  %s849_s1, 896, %s32_s25, [#allocation6], %s699_s11, %s699_s11, %s700_s12  }
  0x14   :  { %s701_s15 = smov [#allocation2]   ;;  %s702_s17 = smov [#allocation7]  }
  0x15   :  { %s22_s16 = sshll.u32 %s701_s15, 4  ;;  %s45_s18 = sshll.u32 %s702_s17, 4  ;;  %s23_s16 = int_to_ptr.vmem [resolvable:$true] %s22_s16  ;;  %s46_s18 = int_to_ptr.vmem [resolvable:$true] %s45_s18 }
  0x16   :  { %s602_s21 = scalar_lea.hbm %s848_s0, 128 }
  0x17   :  { %p603_p8 = scmp.ne.s32.totalorder %s848_s0, %s602_s21  ;;  %p606_p9 = scmp.lt.u32.totalorder %s602_s21, %s848_s0 }
  0x19   :  { %p608_p10 = pnand %p606_p9, %p603_p8 }
  0x1b   :  { %611 = shalt.err (!%p608_p10)
}
  0x1c   :  { %s612_s1 = scalar_lea.vmem %s23_s16, 128  ;;  %p617_p12 = scmp.lt.s32.totalorder %s23_s16, %s23_s16 }
  0x1d   :  { %p613_p11 = scmp.ne.s32.totalorder %s23_s16, %s612_s1  ;;  %p618_p13 = scmp.lt.s32.totalorder %s612_s1, %s612_s1 }
  0x1f   :  { %p619_p0 = por %p618_p13, %p617_p12 }
  0x21   :  { %p620_p1 = pnand %p619_p0, %p613_p11 }
  0x23   :  { %623 = shalt.err (!%p620_p1)
}
  0x24   :  { %25 = dma.hbm_to_vmem [thread:$0]  %s848_s0, 128, %s23_s16, [#allocation3]  }
  0x25   :  { %s624_s30 = scalar_lea.hbm %s851_s3, 2048 }
  0x26   :  { %p625_p2 = scmp.ne.s32.totalorder %s851_s3, %s624_s30  ;;  %p628_p3 = scmp.lt.u32.totalorder %s624_s30, %s851_s3 }
  0x28   :  { %p630_p4 = pnand %p628_p3, %p625_p2 }
  0x2a   :  { %633 = shalt.err (!%p630_p4)
}
  0x2b   :  { %s634_s14 = scalar_lea.vmem %s46_s18, 2048  ;;  %p639_p6 = scmp.lt.s32.totalorder %s46_s18, %s46_s18 }
  0x2c   :  { %p635_p5 = scmp.ne.s32.totalorder %s46_s18, %s634_s14  ;;  %p640_p7 = scmp.lt.s32.totalorder %s634_s14, %s634_s14 }
  0x2e   :  { %p641_p8 = por %p640_p7, %p639_p6 }
  0x30   :  { %p642_p9 = pnand %p641_p8, %p635_p5 }
  0x32   :  { %645 = shalt.err (!%p642_p9)
}
  0x33   :  { %51 = dma.hbm_to_vmem [thread:$0]  %s851_s3, 2048, %s46_s18, [#allocation6], %s699_s11, %s699_s11, %s700_s12  }
  0x34   :  { %s703_s16 = smov [#allocation8]   ;;  %s646_s21 = scalar_lea.hbm %s853_s5, 2048 }
  0x35   :  { %s59_s17 = sshll.u32 %s703_s16, 4  ;;  %p647_p10 = scmp.ne.s32.totalorder %s853_s5, %s646_s21  ;;  %s60_s17 = int_to_ptr.vmem [resolvable:$true] %s59_s17 }
  0x36   :  { %p650_p11 = scmp.lt.u32.totalorder %s646_s21, %s853_s5 }
  0x38   :  { %p652_p12 = pnand %p650_p11, %p647_p10 }
  0x3a   :  { %655 = shalt.err (!%p652_p12)
}
  0x3b   :  { %s656_s1 = scalar_lea.vmem %s60_s17, 2048  ;;  %p661_p0 = scmp.lt.s32.totalorder %s60_s17, %s60_s17 }
  0x3c   :  { %p657_p13 = scmp.ne.s32.totalorder %s60_s17, %s656_s1  ;;  %p662_p1 = scmp.lt.s32.totalorder %s656_s1, %s656_s1 }
  0x3e   :  { %p663_p2 = por %p662_p1, %p661_p0 }
  0x40   :  { %p664_p3 = pnand %p663_p2, %p657_p13 }
  0x42   :  { %667 = shalt.err (!%p664_p3)
}
  0x43   :  { %65 = dma.hbm_to_vmem [thread:$0]  %s853_s5, 2048, %s60_s17, [#allocation9], %s699_s11, %s699_s11, %s700_s12  }
  0x44   :  { %690 = dma.done.wait [#allocation3], 128  }
  0x45   :  { %691 = vsyncadd [#allocation3], 4294967168 }
  0x46   :  { %692 = dma.done.wait [#allocation6], 2944  }
  0x47   :  { %693 = vsyncadd [#allocation6], 4294964352 }
  0x48   :  { %694 = dma.done.wait [#allocation9], 2048  }
  0x49   :  { %695 = vsyncadd [#allocation9], 4294965248  ;;  %v704_v0 = vmov 0.0|0.0   ;;  %vm705_vm0 = vmmov 0   ;;  %v706_v1 = vmov 0.0   ;;  %v81_v2 = vld [vmem:[#allocation5] sm:$0xff] }
  0x4a   :  { %513 = vmatprep.subr.bf16.mxu0 %v704_v0  ;;  %440 = vmatprep.mubr.msk.f32.mxu0 %vm705_vm0, %v706_v1  ;;  %v82_v3 = vld [vmem:[#allocation5 + $0x8] sm:$0xff]  ;;  %v83_v4 = vld [vmem:[#allocation5 + $0x10] sm:$0xff]  ;;  %v84_v6 = vld [vmem:[#allocation5 + $0x18] sm:$0xff]  ;;  %vm99_vm1 = vcmask 1043456   ;;  %vm95_vm2 = vcmask 424960   ;;  %s707_s28 = smov [#allocation10]  }
  0x4b   :  { %522 = vmatprep.subr.bf16.mxu1 %v704_v0  ;;  %475 = vmatprep.mubr.msk.f32.mxu1 %vm705_vm0, %v706_v1  ;;  %v514_v5 = vpack.c.bf16 %v82_v3, %v81_v2  ;;  %v174_v7 = vld [vmem:[#allocation7] sm:$0xff]  ;;  %v517_v8 = vpack.c.bf16 %v84_v6, %v83_v4  ;;  %v175_v9 = vld [vmem:[#allocation7 + $0x8] sm:$0xff]  ;;  %v176_v10 = vld [vmem:[#allocation7 + $0x10] sm:$0xff]  ;;  %s368_s29 = sshll.u32 %s707_s28, 4  ;;  %s369_s29 = int_to_ptr.vmem [resolvable:$true] %s368_s29 }
  0x4c   :  { %v177_v11 = vld [vmem:[#allocation7 + $0x18] sm:$0xff]  ;;  %v85_v12 = vld [vmem:[#allocation5 + $0x20] sm:$0xff]  ;;  %v86_v13 = vld [vmem:[#allocation5 + $0x28] sm:$0xff]  ;;  %v523_v14 = vpack.c.bf16 %v175_v9, %v174_v7  ;;  %s668_s30 = scalar_lea.vmem %s369_s29, 128  ;;  %p673_p5 = scmp.lt.s32.totalorder %s369_s29, %s369_s29 }
  0x4d   :  { %515 = vmatpush3.bf16.msra.mxu0 %v514_v5  ;;  %v526_v15 = vpack.c.bf16 %v177_v11, %v176_v10  ;;  %v520_v16 = vpack.c.bf16 %v86_v13, %v85_v12  ;;  %v178_v17 = vld [vmem:[#allocation7 + $0x20] sm:$0xff]  ;;  %v179_v18 = vld [vmem:[#allocation7 + $0x28] sm:$0xff]  ;;  %v180_v20 = vld [vmem:[#allocation7 + $0x30] sm:$0xff]  ;;  %p669_p4 = scmp.ne.s32.totalorder %s369_s29, %s668_s30  ;;  %p674_p6 = scmp.lt.s32.totalorder %s668_s30, %s668_s30 }
  0x4e   :  { %516 = vmatprep.subr.bf16.mxu0 %v704_v0  ;;  %524 = vmatpush3.bf16.msra.mxu1 %v523_v14  ;;  %v529_v19 = vpack.c.bf16 %v179_v18, %v178_v17  ;;  %v181_v21 = vld [vmem:[#allocation7 + $0x38] sm:$0xff]  ;;  %v80_v23 = vld [vmem:[#allocation2] sm:$0xff]  ;;  %v183_v26 = vld [vmem:[#allocation7 + $0x48] sm:$0xff] }
  0x4f   :  { %525 = vmatprep.subr.bf16.mxu1 %v704_v0  ;;  %v87_v22 = vld [vmem:[#allocation5 + $0x30] sm:$0xf]  ;;  %v532_v24 = vpack.c.bf16 %v181_v21, %v180_v20  ;;  %v182_v25 = vld [vmem:[#allocation7 + $0x40] sm:$0xff]  ;;  %v184_v28 = vld [vmem:[#allocation7 + $0x50] sm:$0xff]  ;;  %p675_p7 = por %p674_p6, %p673_p5 }
  0x50   :  { %v535_v27 = vpack.c.bf16 %v183_v26, %v182_v25  ;;  %v185_v29 = vld [vmem:[#allocation7 + $0x58] sm:$0xff]  ;;  %v186_v31 = vld [vmem:[#allocation7 + $0x60] sm:$0xff]  ;;  %v187_v32 = vld [vmem:[#allocation7 + $0x68] sm:$0xff] }
  0x51   :  { %518 = vmatpush3.bf16.msra.mxu0 %v517_v8  ;;  %v538_v30 = vpack.c.bf16 %v185_v29, %v184_v28  ;;  %v541_v33 = vpack.c.bf16 %v187_v32, %v186_v31  ;;  %v188_v34 = vld [vmem:[#allocation7 + $0x70] sm:$0xff]  ;;  %v189_v35 = vld [vmem:[#allocation7 + $0x78] sm:$0xff]  ;;  %v268_v37 = vld [vmem:[#allocation8] sm:$0xff]  ;;  %p676_p8 = pnand %p675_p7, %p669_p4 }
  0x52   :  { %519 = vmatprep.subr.bf16.mxu0 %v704_v0  ;;  %527 = vmatpush3.bf16.msra.mxu1 %v526_v15  ;;  %v544_v36 = vpack.c.bf16 %v189_v35, %v188_v34  ;;  %v269_v38 = vld [vmem:[#allocation8 + $0x8] sm:$0xff]  ;;  %v270_v39 = vld [vmem:[#allocation8 + $0x10] sm:$0xff]  ;;  %v271_v41 = vld [vmem:[#allocation8 + $0x18] sm:$0xff] }
  0x53   :  { %528 = vmatprep.subr.bf16.mxu1 %v704_v0  ;;  %v547_v40 = vpack.c.bf16 %v269_v38, %v268_v37  ;;  %v550_v42 = vpack.c.bf16 %v271_v41, %v270_v39  ;;  %v272_v43 = vld [vmem:[#allocation8 + $0x20] sm:$0xff]  ;;  %v273_v44 = vld [vmem:[#allocation8 + $0x28] sm:$0xff]  ;;  %v274_v46 = vld [vmem:[#allocation8 + $0x30] sm:$0xff] }
  0x54   :  { %v553_v45 = vpack.c.bf16 %v273_v44, %v272_v43  ;;  %v275_v47 = vld [vmem:[#allocation8 + $0x38] sm:$0xff]  ;;  %v276_v49 = vld [vmem:[#allocation8 + $0x40] sm:$0xff]  ;;  %v277_v50 = vld [vmem:[#allocation8 + $0x48] sm:$0xff] }
  0x55   :  { %521 = vmatpush3.bf16.msra.mxu0 %v520_v16  ;;  %v556_v48 = vpack.c.bf16 %v275_v47, %v274_v46  ;;  %v559_v51 = vpack.c.bf16 %v277_v50, %v276_v49  ;;  %v278_v52 = vld [vmem:[#allocation8 + $0x50] sm:$0xff]  ;;  %v279_v53 = vld [vmem:[#allocation8 + $0x58] sm:$0xff]  ;;  %v280_v55 = vld [vmem:[#allocation8 + $0x60] sm:$0xff] }
  0x56   :  { %438 = vmatprep.subr.mxu0 %v706_v1  ;;  %530 = vmatpush3.bf16.msra.mxu1 %v529_v19  ;;  %v562_v54 = vpack.c.bf16 %v279_v53, %v278_v52  ;;  %v281_v56 = vld [vmem:[#allocation8 + $0x68] sm:$0xff]  ;;  %v379_v58 = vld [vmem:[%s850_s2] ss:$0 sm:$0xff]  ;;  %v282_v63 = vld [vmem:[#allocation8 + $0x70] sm:$0xff] }
  0x57   :  { %531 = vmatprep.subr.bf16.mxu1 %v704_v0  ;;  %v565_v57 = vpack.c.bf16 %v281_v56, %v280_v55  ;;  %v382_v3 = vld [vmem:[%s852_s4] ss:$0 sm:$0xff] }
  0x58   :  { %v383_v7 = vld [vmem:[%s854_s6] ss:$0 sm:$0xff] }
  0x59   :  { %439 = vmatpush3.msk.msra.mxu0 %vm99_vm1, %v87_v22 }
  0x5a   :  { %441 = vmatmul.mubr.msk.f32.vlgmr.msra.gmra.mrb[0].mxu0 %vm95_vm2, %v80_v23  ;;  %546 = vmatprep.subr.bf16.mxu0 %v704_v0 }
  0x5b   :  { %510 = vmatprep.mubr.msk.f32.mxu0 %vm705_vm0, %v706_v1  ;;  %533 = vmatpush3.bf16.msra.mxu1 %v532_v24  ;;  %v283_v1 = vld [vmem:[#allocation8 + $0x78] sm:$0xff] }
  0x5c   :  { %534 = vmatprep.subr.bf16.mxu1 %v704_v0  ;;  %548 = vmatpush3.bf16.msra.mxu0 %v547_v40  ;;  %v568_v2 = vpack.c.bf16 %v283_v1, %v282_v63 }
  0x5d   :  { %549 = vmatprep.subr.bf16.mxu0 %v704_v0 }
  0x5f   :  { %536 = vmatpush3.bf16.msra.mxu1 %v535_v27 }
  0x60   :  { %537 = vmatprep.subr.bf16.mxu1 %v704_v0  ;;  %551 = vmatpush3.bf16.msra.mxu0 %v550_v42 }
  0x61   :  { %552 = vmatprep.subr.bf16.mxu0 %v704_v0 }
  0x63   :  { %539 = vmatpush3.bf16.msra.mxu1 %v538_v30 }
  0x64   :  { %540 = vmatprep.subr.bf16.mxu1 %v704_v0  ;;  %554 = vmatpush3.bf16.msra.mxu0 %v553_v45 }
  0x65   :  { %555 = vmatprep.subr.bf16.mxu0 %v704_v0 }
  0x67   :  { %542 = vmatpush3.bf16.msra.mxu1 %v541_v33 }
  0x68   :  { %543 = vmatprep.subr.bf16.mxu1 %v704_v0  ;;  %557 = vmatpush3.bf16.msra.mxu0 %v556_v48 }
  0x69   :  { %558 = vmatprep.subr.bf16.mxu0 %v704_v0 }
  0x6b   :  { %545 = vmatpush3.bf16.msra.mxu1 %v544_v36 }
  0x6c   :  { %560 = vmatpush3.bf16.msra.mxu0 %v559_v51 }
  0x6d   :  { %561 = vmatprep.subr.bf16.mxu0 %v704_v0 }
  0x70   :  { %563 = vmatpush3.bf16.msra.mxu0 %v562_v54 }
  0x71   :  { %564 = vmatprep.subr.bf16.mxu0 %v704_v0 }
  0x74   :  { %566 = vmatpush3.bf16.msra.mxu0 %v565_v57 }
  0x75   :  { %567 = vmatprep.subr.bf16.mxu0 %v704_v0 }
  0x78   :  { %569 = vmatpush3.bf16.msra.mxu0 %v568_v2 }
 0x12d   :  { %v169_v59 = vpop.f32.mrb[0].mxu0 }
 0x12e   :  { %v170_v60 = vadd.f32 %v379_v58, %v169_v59  ;;  %v442_v61 = vpop.f32.mrb[1].mxu0 }
 0x130   :  { %v173_v62 = vmax.f32 %v170_v60, 0.0 }
 0x132   :  { %476 = vmatmul.mubr.f32.vlgmr.msra.gmra.mrb[0].mxu1 %v173_v62 }
 0x205   :  { %v263_v4 = vpop.f32.mrb[0].mxu1 }
 0x206   :  { %v264_v5 = vadd.f32 %v382_v3, %v263_v4  ;;  %v477_v0 = vpop.f32.mrb[1].mxu1 }
 0x208   :  { %v267_v6 = vmax.f32 %v264_v5, 0.0 }
 0x20a   :  { %511 = vmatmul.mubr.f32.vlgmr.msra.gmra.mrb[2].mxu0 %v267_v6 }
 0x2dd   :  { %v357_v8 = vpop.f32.mrb[2].mxu0 }
 0x2de   :  { %v358_v9 = vadd.f32 %v383_v7, %v357_v8  ;;  %v512_v10 = vpop.f32.mrb[3].mxu0 }
 0x2e0   :  { %361 = vst [vmem:[#allocation10] sm:$0xff] %v358_v9 }
 0x2e1   :  { %679 = shalt.err (!%p676_p8)
}
 0x2e2   :  { %s680_s9 = scalar_lea.hbm %s855_s7, 128 }
 0x2e3   :  { %p681_p9 = scmp.ne.s32.totalorder %s855_s7, %s680_s9  ;;  %p684_p10 = scmp.lt.u32.totalorder %s680_s9, %s855_s7 }
 0x2e5   :  { %p686_p11 = pnand %p684_p10, %p681_p9 }
 0x2e7   :  { %689 = shalt.err (!%p686_p11)
}
 0x2e8   :  { %371 = dma.vmem_to_hbm [thread:$0]  %s369_s29, 128, %s855_s7, [#allocation4]  }
 0x2e9   :  { %696 = dma.done.wait [#allocation4], 128  }
 0x2ea   :  { %697 = vsyncadd [#allocation4], 4294967168 }
 0x2eb   :  { %375 = vsyncpa [#allocation3], 1 }
 0x2ec   :  { %376 = vsyncpa [#allocation6], 1 }
 0x2ed   :  { %377 = vsyncpa [#allocation9], 1 }
 0x2ee   :  { %378 = vsyncpa [#allocation4], 1 }

</bundles_post_ra>
